<compile_context>
chip_gen: v5e
topology: v5e:2x2
jax: 0.10.0
libtpu: 0.0.40
codegen_flags: <defaults>
</compile_context>

<pallas_src>
import functools
import math

import jax
import jax.numpy as jnp
from jax.experimental import pallas as pl
from jax.experimental.pallas import tpu as pltpu


def _round_up(x, m):
    return ((x + m - 1) // m) * m


def _fused_mlp_kernel(*refs, n_layers: int, sub: int, n_sub: int):
    """refs = (xT_ref, w0, b0, ..., w_{L-1}, b_{L-1}, oT_ref).

    xT_ref: (d_in, tm) block (feature-major), oT_ref: (d_out, tm) block.
    w_i: (d_out_i, d_in_i) [nn.Linear layout], b_i: (d_out_i, 1).
    """
    xT_ref = refs[0]
    oT_ref = refs[-1]
    params = refs[1:-1]

    def mlp_chain(h):  # h: (d_in, sub) f32
        for i in range(n_layers):
            w = params[2 * i][...]        # (d_out, d_in) — resident, tiny
            b = params[2 * i + 1][...]    # (d_out, 1)
            # MXU matmul, f32 accumulation; bias + ReLU are free VPU filler.
            h = jnp.dot(w, h, preferred_element_type=jnp.float32) + b
            if i < n_layers - 1:          # hidden layers only
                h = jnp.maximum(h, 0.0)
        return h

    if n_sub == 1:
        oT_ref[...] = mlp_chain(xT_ref[...].astype(jnp.float32)).astype(oT_ref.dtype)
    else:
        def body(j, carry):
            c0 = pl.multiple_of(j * sub, sub)     # 128-aligned lane offset
            h = mlp_chain(xT_ref[:, pl.ds(c0, sub)].astype(jnp.float32))
            oT_ref[:, pl.ds(c0, sub)] = h.astype(oT_ref.dtype)
            return carry
        jax.lax.fori_loop(0, n_sub, body, None)


def fused_mlp(x, params, *, tm=None):
    """x: (B, d_in); params: list of (w: (d_out_i, d_in_i), b: (d_out_i, 1)).

    Returns (B, d_out_last). Whole MLP fused into one pallas_call.
    """
    B, d_in = x.shape
    assert params and params[0][0].shape[1] == d_in
    n_layers = len(params)
    d_out = params[-1][0].shape[0]

    # Row tile (on the lane axis of the transposed layout):
    #  * B <= 128: one small tile (launch cost dominates anyway).
    #  * B  > 128: big tiles (up to 1024) for DMA / per-step-overhead
    #    efficiency, but at least 2 grid steps so v7x's 2 TCs both get work.
    if tm is None:
        if B <= 128:
            tm = _round_up(max(B, 8), 8)
        else:
            tm = min(1024, _round_up(pl.cdiv(B, 2), 128))
    B_pad = _round_up(B, tm)

    # In-kernel sub-tile (bounds vreg live ranges at large tm).
    sub = min(tm, 128)
    assert tm % sub == 0
    n_sub = tm // sub

    # Feature-major layout: batch axis on lanes (dense loads/stores).
    xT = jnp.transpose(x)                                    # (d_in, B)
    if B_pad != B:
        xT = jnp.pad(xT, ((0, 0), (0, B_pad - B)))

    in_specs = [pl.BlockSpec((d_in, tm), lambda i: (0, i))]
    flat_params = []
    for (w, b) in params:
        # Full-array blocks pinned to (0, 0): stay resident across grid steps.
        in_specs.append(pl.BlockSpec(w.shape, lambda i: (0, 0)))
        in_specs.append(pl.BlockSpec(b.shape, lambda i: (0, 0)))
        flat_params.extend((w, b))

    outT = pl.pallas_call(
        functools.partial(_fused_mlp_kernel, n_layers=n_layers, sub=sub, n_sub=n_sub),
        out_shape=jax.ShapeDtypeStruct((d_out, B_pad), x.dtype),
        grid=(B_pad // tm,),
        in_specs=in_specs,
        out_specs=pl.BlockSpec((d_out, tm), lambda i: (0, i)),
        compiler_params=pltpu.CompilerParams(
            dimension_semantics=("parallel",)
        ),
    )(xT, *flat_params)

    return jnp.transpose(outT[:, :B])                        # (B, d_out)


def init_mlp_params(key, h_sizes, out_size, dtype=jnp.float32):
    """nn.Linear-equivalent init: U(-1/sqrt(fan_in), +1/sqrt(fan_in)).

    Weight layout matches nn.Linear: (out_features, in_features); bias (out, 1).
    """
    params = []
    sizes = list(h_sizes) + [out_size]
    for k in range(len(sizes) - 1):
        fan_in, fan_out = sizes[k], sizes[k + 1]
        key, kw, kb = jax.random.split(key, 3)
        bound = 1.0 / math.sqrt(fan_in)
        w = jax.random.uniform(kw, (fan_out, fan_in), dtype, -bound, bound)
        b = jax.random.uniform(kb, (fan_out, 1), dtype, -bound, bound)
        params.append((w, b))
    return params


def mlp_reference(x, params):
    """Pure-JAX reference (highest-precision matmuls)."""
    n = len(params)
    for i, (w, b) in enumerate(params):
        x = jnp.dot(x, w.T, precision=jax.lax.Precision.HIGHEST) + b[:, 0]
        if i < n - 1:
            x = jnp.maximum(x, 0.0)
    return x


if __name__ == "__main__":
    # MLP(h_sizes=[32, 64, 32], out_size=16, l2_scaling=1.0) — l2_scaling is
    # unused in forward().
    h_sizes = [32, 64, 32]
    out_size = 16

    key = jax.random.PRNGKey(0)
    key, kp = jax.random.split(key)
    params = init_mlp_params(kp, h_sizes, out_size)

    # Case 1: small deployed shape (single grid step, single sub-tile).
    key, kx = jax.random.split(key)
    x_small = jax.random.normal(kx, (8, h_sizes[0]), dtype=jnp.float32)
    out_small = jax.block_until_ready(fused_mlp(x_small, params))
    ref_small = mlp_reference(x_small, params)
    assert out_small.shape == (8, out_size)
    # Tolerance accommodates MXU pass-precision differences vs HIGHEST ref.
    assert float(jnp.max(jnp.abs(out_small - ref_small))) < 2e-2

    # Case 2: larger batch exercising multi-step grid + inner sub-tile loop
    # (B=384 -> tm=256, 2 grid steps, 2 sub-tiles each, padded rows sliced off).
    key, kx2 = jax.random.split(key)
    x_big = jax.random.normal(kx2, (384, h_sizes[0]), dtype=jnp.float32)
    out_big = jax.block_until_ready(fused_mlp(x_big, params))
    ref_big = mlp_reference(x_big, params)
    assert out_big.shape == (384, out_size)
    assert float(jnp.max(jnp.abs(out_big - ref_big))) < 2e-2

    print("KERNEL_OK")
</pallas_src>

<mosaic_0001>
module attributes {stable_mosaic.version = 11 : i64} {
  func.func @_fused_mlp_kernel(%arg0: i32, %arg1: memref<32x8xf32, #tpu.memory_space<vmem>>, %arg2: memref<64x32xf32, #tpu.memory_space<vmem>>, %arg3: memref<64x1xf32, #tpu.memory_space<vmem>>, %arg4: memref<32x64xf32, #tpu.memory_space<vmem>>, %arg5: memref<32x1xf32, #tpu.memory_space<vmem>>, %arg6: memref<16x32xf32, #tpu.memory_space<vmem>>, %arg7: memref<16x1xf32, #tpu.memory_space<vmem>>, %arg8: memref<16x8xf32, #tpu.memory_space<vmem>>) attributes {dimension_semantics = [#tpu.dimension_semantics<parallel>], iteration_bounds = array<i64: 1>, scalar_prefetch = 0 : i64, scratch_operands = 0 : i64, tpu.core_type = #tpu.core_type<tc>, window_params = [{transform_indices = @transform_0, window_bounds = array<i64: 32, 8>}, {pipeline_mode = #tpu.pipeline_mode<synchronous>, transform_indices = @transform_1, window_bounds = array<i64: 64, 32>}, {pipeline_mode = #tpu.pipeline_mode<synchronous>, transform_indices = @transform_2, window_bounds = array<i64: 64, 1>}, {pipeline_mode = #tpu.pipeline_mode<synchronous>, transform_indices = @transform_3, window_bounds = array<i64: 32, 64>}, {pipeline_mode = #tpu.pipeline_mode<synchronous>, transform_indices = @transform_4, window_bounds = array<i64: 32, 1>}, {pipeline_mode = #tpu.pipeline_mode<synchronous>, transform_indices = @transform_5, window_bounds = array<i64: 16, 32>}, {pipeline_mode = #tpu.pipeline_mode<synchronous>, transform_indices = @transform_6, window_bounds = array<i64: 16, 1>}, {transform_indices = @transform_7, window_bounds = array<i64: 16, 8>}]} {
    %c0 = arith.constant 0 : index
    %c0_0 = arith.constant 0 : index
    %0 = vector.load %arg1[%c0, %c0_0] : memref<32x8xf32, #tpu.memory_space<vmem>>, vector<32x8xf32>
    %c0_1 = arith.constant 0 : index
    %c0_2 = arith.constant 0 : index
    %1 = vector.load %arg2[%c0_1, %c0_2] : memref<64x32xf32, #tpu.memory_space<vmem>>, vector<64x32xf32>
    %c0_3 = arith.constant 0 : index
    %c0_4 = arith.constant 0 : index
    %2 = vector.load %arg3[%c0_3, %c0_4] : memref<64x1xf32, #tpu.memory_space<vmem>>, vector<64x1xf32>
    %cst = arith.constant dense<0.000000e+00> : vector<64x8xf32>
    %3 = tpu.matmul %1, %0, %cst {dimension_numbers = #tpu.dot_dimension_numbers<[1], [0], [0], [1], [0, 0, 1, 1], [], []>} : vector<64x32xf32>, vector<32x8xf32>, vector<64x8xf32> -> vector<64x8xf32>
    %4 = vector.broadcast %2 : vector<64x1xf32> to vector<64x8xf32>
    %5 = arith.addf %3, %4 : vector<64x8xf32>
    %cst_5 = arith.constant 0.000000e+00 : f32
    %6 = vector.broadcast %cst_5 : f32 to vector<64x8xf32>
    %7 = arith.maximumf %5, %6 : vector<64x8xf32>
    %c0_6 = arith.constant 0 : index
    %c0_7 = arith.constant 0 : index
    %8 = vector.load %arg4[%c0_6, %c0_7] : memref<32x64xf32, #tpu.memory_space<vmem>>, vector<32x64xf32>
    %c0_8 = arith.constant 0 : index
    %c0_9 = arith.constant 0 : index
    %9 = vector.load %arg5[%c0_8, %c0_9] : memref<32x1xf32, #tpu.memory_space<vmem>>, vector<32x1xf32>
    %cst_10 = arith.constant dense<0.000000e+00> : vector<32x8xf32>
    %10 = tpu.matmul %8, %7, %cst_10 {dimension_numbers = #tpu.dot_dimension_numbers<[1], [0], [0], [1], [0, 0, 1, 1], [], []>} : vector<32x64xf32>, vector<64x8xf32>, vector<32x8xf32> -> vector<32x8xf32>
    %11 = vector.broadcast %9 : vector<32x1xf32> to vector<32x8xf32>
    %12 = arith.addf %10, %11 : vector<32x8xf32>
    %cst_11 = arith.constant 0.000000e+00 : f32
    %13 = vector.broadcast %cst_11 : f32 to vector<32x8xf32>
    %14 = arith.maximumf %12, %13 : vector<32x8xf32>
    %c0_12 = arith.constant 0 : index
    %c0_13 = arith.constant 0 : index
    %15 = vector.load %arg6[%c0_12, %c0_13] : memref<16x32xf32, #tpu.memory_space<vmem>>, vector<16x32xf32>
    %c0_14 = arith.constant 0 : index
    %c0_15 = arith.constant 0 : index
    %16 = vector.load %arg7[%c0_14, %c0_15] : memref<16x1xf32, #tpu.memory_space<vmem>>, vector<16x1xf32>
    %cst_16 = arith.constant dense<0.000000e+00> : vector<16x8xf32>
    %17 = tpu.matmul %15, %14, %cst_16 {dimension_numbers = #tpu.dot_dimension_numbers<[1], [0], [0], [1], [0, 0, 1, 1], [], []>} : vector<16x32xf32>, vector<32x8xf32>, vector<16x8xf32> -> vector<16x8xf32>
    %18 = vector.broadcast %16 : vector<16x1xf32> to vector<16x8xf32>
    %19 = arith.addf %17, %18 : vector<16x8xf32>
    %c0_17 = arith.constant 0 : index
    %c0_18 = arith.constant 0 : index
    %20 = vector.load %arg8[%c0_17, %c0_18] : memref<16x8xf32, #tpu.memory_space<vmem>>, vector<16x8xf32>
    tpu.vector_store %arg8[%c0_17, %c0_18], %19 {strides = array<i32>} : memref<16x8xf32, #tpu.memory_space<vmem>>, vector<16x8xf32>,
    return
  }
  func.func @transform_0(%arg0: i32) -> (i32, i32) {
    %c0_i32 = arith.constant 0 : i32
    %c0_i32_0 = arith.constant 0 : i32
    return %c0_i32, %arg0 : i32, i32
  }
  func.func @transform_1(%arg0: i32) -> (i32, i32) {
    %c0_i32 = arith.constant 0 : i32
    %c0_i32_0 = arith.constant 0 : i32
    %c0_i32_1 = arith.constant 0 : i32
    return %c0_i32, %c0_i32_0 : i32, i32
  }
  func.func @transform_2(%arg0: i32) -> (i32, i32) {
    %c0_i32 = arith.constant 0 : i32
    %c0_i32_0 = arith.constant 0 : i32
    %c0_i32_1 = arith.constant 0 : i32
    return %c0_i32, %c0_i32_0 : i32, i32
  }
  func.func @transform_3(%arg0: i32) -> (i32, i32) {
    %c0_i32 = arith.constant 0 : i32
    %c0_i32_0 = arith.constant 0 : i32
    %c0_i32_1 = arith.constant 0 : i32
    return %c0_i32, %c0_i32_0 : i32, i32
  }
  func.func @transform_4(%arg0: i32) -> (i32, i32) {
    %c0_i32 = arith.constant 0 : i32
    %c0_i32_0 = arith.constant 0 : i32
    %c0_i32_1 = arith.constant 0 : i32
    return %c0_i32, %c0_i32_0 : i32, i32
  }
  func.func @transform_5(%arg0: i32) -> (i32, i32) {
    %c0_i32 = arith.constant 0 : i32
    %c0_i32_0 = arith.constant 0 : i32
    %c0_i32_1 = arith.constant 0 : i32
    return %c0_i32, %c0_i32_0 : i32, i32
  }
  func.func @transform_6(%arg0: i32) -> (i32, i32) {
    %c0_i32 = arith.constant 0 : i32
    %c0_i32_0 = arith.constant 0 : i32
    %c0_i32_1 = arith.constant 0 : i32
    return %c0_i32, %c0_i32_0 : i32, i32
  }
  func.func @transform_7(%arg0: i32) -> (i32, i32) {
    %c0_i32 = arith.constant 0 : i32
    %c0_i32_0 = arith.constant 0 : i32
    return %c0_i32, %arg0 : i32, i32
  }
}

</mosaic_0001>

<bundles_post_ra>
// kernel: tpu_custom_call.1
= control target key start
LH: loop header
LB: loop body
LE: loop exit
PB: predicated region body
PF: predicated region fallthrough
CT: control target
= control target key end

     0   :  { %v314_v2 = vmov 0   ;;  %vm86_vm0 = vcmask 261120   ;;  %vm188_vm1 = vcmask 523264   ;;  %vm277_vm2 = vcmask 64512   ;;  %s467_s0 = inlined_call_operand.vmem [shape: f32[32,8], index: 0, kind: input, shape index: {}]   ;;  %s468_s2 = inlined_call_operand.vmem [shape: f32[64,1], index: 2, kind: input, shape index: {}]   ;;  %s469_s1 = inlined_call_operand.vmem [shape: f32[64,32], index: 1, kind: input, shape index: {}]   ;;  %s470_s4 = inlined_call_operand.vmem [shape: f32[32,1], index: 4, kind: input, shape index: {}]   ;;  %s471_s6 = inlined_call_operand.vmem [shape: f32[16,1], index: 6, kind: input, shape index: {}]   ;;  %s472_s3 = inlined_call_operand.vmem [shape: f32[32,64], index: 3, kind: input, shape index: {}]   ;;  %s473_s5 = inlined_call_operand.vmem [shape: f32[16,32], index: 5, kind: input, shape index: {}]   ;;  %s474_s7 = inlined_call_operand.vmem [shape: f32[16,8], index: 7, kind: output, shape index: {}]  }
   0x1   :  { %v29_v0 = vld [vmem:[%s467_s0 + $0x18] sm:$0xff]  ;;  %v28_v1 = vld [vmem:[%s467_s0 + $0x10] sm:$0xff]  ;;  %311 = vset.pattern.permute.xlu0 %v314_v2  ;;  %312 = vset.pattern.permute.xlu1 %v314_v2  ;;  %v27_v4 = vld [vmem:[%s467_s0 + $0x8] sm:$0xff] }
   0x2   :  { %298 = vmatpush.msra.mxu3 %v29_v0  ;;  %123 = vmatpush.msra.mxu0 %v29_v0  ;;  %v45_v3 = vld [vmem:[%s468_s2 + $0x38] sm:$0xff]  ;;  %v43_v5 = vld [vmem:[%s468_s2 + $0x28] sm:$0xff]  ;;  %v26_v6 = vld [vmem:[%s467_s0] sm:$0xff] }
   0x3   :  { %83 = vperm.xlu0 %311, %v45_v3   ;;  %313 = vset.pattern.permute.xlu2 %v314_v2  ;;  %v34_v7 = vld [vmem:[%s469_s1 + $0x20] sm:$0xff]  ;;  %v44_v9 = vld [vmem:[%s468_s2 + $0x30] sm:$0xff]  ;;  %v41_v10 = vld [vmem:[%s468_s2 + $0x18] sm:$0xff] }
   0x4   :  { %299 = vmatpush.msra.mxu3 %v28_v1  ;;  %124 = vmatpush.msra.mxu0 %v28_v1  ;;  %v30_v8 = vld [vmem:[%s469_s1] sm:$0xff]  ;;  %v35_v12 = vld [vmem:[%s469_s1 + $0x28] sm:$0xff]  ;;  %v40_v14 = vld [vmem:[%s468_s2 + $0x10] sm:$0xff] }
   0x5   :  { %73 = vperm.xlu1 %312, %v43_v5   ;;  %v42_v11 = vld [vmem:[%s468_s2 + $0x20] sm:$0xff]  ;;  %63 = vperm.xlu2 %313, %v41_v10   ;;  %v31_v13 = vld [vmem:[%s469_s1 + $0x8] sm:$0xff]  ;;  %v36_v17 = vld [vmem:[%s469_s1 + $0x30] sm:$0xff] }
   0x6   :  { %300 = vmatpush.msra.mxu3 %v27_v4  ;;  %125 = vmatpush.msra.mxu0 %v27_v4  ;;  %v39_v15 = vld [vmem:[%s468_s2 + $0x8] sm:$0xff]  ;;  %v38_v16 = vld [vmem:[%s468_s2] sm:$0xff]  ;;  %v32_v18 = vld [vmem:[%s469_s1 + $0x10] sm:$0xff] }
   0x7   :  { %v167_v19 = vld [vmem:[%s470_s4 + $0x18] sm:$0xff]  ;;  %v166_v20 = vld [vmem:[%s470_s4 + $0x10] sm:$0xff]  ;;  %v165_v21 = vld [vmem:[%s470_s4 + $0x8] sm:$0xff] }
   0x8   :  { %301 = vmatpush.msra.mxu3 %v26_v6  ;;  %126 = vmatpush.msra.mxu0 %v26_v6  ;;  %v37_v22 = vld [vmem:[%s469_s1 + $0x38] sm:$0xff]  ;;  %v164_v24 = vld [vmem:[%s470_s4] sm:$0xff]  ;;  %v237_v26 = vld [vmem:[%s471_s6 + $0x8] sm:$0xff] }
   0x9   :  { %288 = vmatmul.msk.f32.vlgmr.msra.gmra.mxu3 %vm86_vm0, %v34_v7  ;;  %284 = vmatmul.msk.f32.vlgmr.msra.gmra.mxu0 %vm86_vm0, %v30_v8  ;;  %v33_v23 = vld [vmem:[%s469_s1 + $0x18] sm:$0xff]  ;;  %v236_v25 = vld [vmem:[%s471_s6] sm:$0xff]  ;;  %v161_v61 = vld [vmem:[%s472_s3 + $0x8] sm:$0xff] }
   0xa   :  { %v160_v59 = vld [vmem:[%s472_s3] sm:$0xff]  ;;  %v163_v60 = vld [vmem:[%s472_s3 + $0x18] sm:$0xff]  ;;  %v162_v62 = vld [vmem:[%s472_s3 + $0x10] sm:$0xff] }
   0xb   :  { %78 = vperm.xlu0 %311, %v44_v9  }
   0xd   :  { %68 = vperm.xlu1 %312, %v42_v11   ;;  %58 = vperm.xlu2 %313, %v40_v14  }
  0x11   :  { %289 = vmatmul.msk.f32.gmra.mxu3 %vm86_vm0, %v35_v12  ;;  %285 = vmatmul.msk.f32.gmra.mxu0 %vm86_vm0, %v31_v13 }
  0x13   :  { %53 = vperm.xlu0 %311, %v39_v15   ;;  %v234_v15 = vld [vmem:[%s473_s5] sm:$0xff] }
  0x15   :  { %48 = vperm.xlu1 %312, %v38_v16   ;;  %185 = vperm.xlu2 %313, %v167_v19   ;;  %v235_v16 = vld [vmem:[%s473_s5 + $0x8] sm:$0xff] }
  0x19   :  { %290 = vmatmul.msk.f32.gmra.mxu3 %vm86_vm0, %v36_v17  ;;  %286 = vmatmul.msk.f32.gmra.mxu0 %vm86_vm0, %v32_v18 }
  0x1b   :  { %180 = vperm.xlu0 %311, %v166_v20  }
  0x1d   :  { %175 = vperm.xlu1 %312, %v165_v21   ;;  %170 = vperm.xlu2 %313, %v164_v24  }
  0x21   :  { %291 = vmatmul.msk.f32.gmra.mxu3 %vm86_vm0, %v37_v22  ;;  %287 = vmatmul.msk.f32.gmra.mxu0 %vm86_vm0, %v33_v23 }
  0x23   :  { %240 = vperm.xlu0 %311, %v236_v25  }
  0x25   :  { %245 = vperm.xlu1 %312, %v237_v26  }
  0x5f   :  { %v64_v35 = vpop.permute.xlu2 %63 }
  0x67   :  { %v59_v48 = vpop.permute.xlu2 %58 }
  0x6f   :  { %v186_v0 = vpop.permute.xlu2 %185 }
  0x75   :  { %v84_v31 = vpop.permute.xlu0 %83 }
  0x77   :  { %v74_v32 = vpop.permute.xlu1 %73  ;;  %v171_v10 = vpop.permute.xlu2 %170 }
  0x7d   :  { %v79_v36 = vpop.permute.xlu0 %78 }
  0x7f   :  { %v69_v40 = vpop.permute.xlu1 %68 }
  0x85   :  { %v54_v51 = vpop.permute.xlu0 %53 }
  0x86   :  { %v128_v27 = vpop.f32.mrf.mxu0 }
  0x87   :  { %v49_v54 = vpop.permute.xlu1 %48 }
  0x88   :  { %v129_v55 = vadd.f32 %v128_v27, %v49_v54 }
  0x8a   :  { %v152_v58 = vmax.f32 %v129_v55, 0.0 }
  0x8c   :  { %v140_v28 = vpop.f32.mrf.mxu3 }
  0x8d   :  { %v141_v44 = vadd.f32 %v140_v28, %v69_v40  ;;  %v181_v5 = vpop.permute.xlu0 %180 }
  0x8e   :  { %v131_v30 = vpop.f32.mrf.mxu0 }
  0x8f   :  { %v156_v49 = vmax.f32 %v141_v44, 0.0  ;;  %v132_v52 = vadd.f32 %v131_v30, %v54_v51  ;;  %v176_v6 = vpop.permute.xlu1 %175 }
  0x91   :  { %v153_v57 = vmax.f32 %v132_v52, 0.0 }
  0x94   :  { %v143_v29 = vpop.f32.mrf.mxu3 }
  0x95   :  { %v144_v41 = vadd.f32 %v143_v29, %v74_v32  ;;  %v241_v17 = vpop.permute.xlu0 %240 }
  0x96   :  { %v134_v34 = vpop.f32.mrf.mxu0 }
  0x97   :  { %v157_v46 = vmax.f32 %v144_v41, 0.0  ;;  %v135_v50 = vadd.f32 %v134_v34, %v59_v48  ;;  %v246_v20 = vpop.permute.xlu1 %245 }
  0x99   :  { %v154_v56 = vmax.f32 %v135_v50, 0.0 }
  0x9c   :  { %v146_v33 = vpop.f32.mrf.mxu3 }
  0x9d   :  { %v147_v38 = vadd.f32 %v146_v33, %v79_v36 }
  0x9e   :  { %v137_v43 = vpop.f32.mrf.mxu0 }
  0x9f   :  { %v158_v45 = vmax.f32 %v147_v38, 0.0  ;;  %v138_v47 = vadd.f32 %v137_v43, %v64_v35 }
  0xa1   :  { %v155_v53 = vmax.f32 %v138_v47, 0.0 }
  0xa4   :  { %v149_v37 = vpop.f32.mrf.mxu3 }
  0xa5   :  { %v150_v39 = vadd.f32 %v149_v37, %v84_v31 }
  0xa7   :  { %v159_v42 = vmax.f32 %v150_v39, 0.0 }
  0xa9   :  { %209 = vmatpush.msra.mxu1 %v159_v42  ;;  %302 = vmatpush.msra.mxu2 %v159_v42 }
  0xab   :  { %210 = vmatpush.msra.mxu1 %v158_v45  ;;  %303 = vmatpush.msra.mxu2 %v158_v45 }
  0xad   :  { %211 = vmatpush.msra.mxu1 %v157_v46  ;;  %304 = vmatpush.msra.mxu2 %v157_v46 }
  0xaf   :  { %212 = vmatpush.msra.mxu1 %v156_v49  ;;  %305 = vmatpush.msra.mxu2 %v156_v49 }
  0xb1   :  { %213 = vmatpush.msra.mxu1 %v155_v53  ;;  %306 = vmatpush.msra.mxu2 %v155_v53 }
  0xb3   :  { %214 = vmatpush.msra.mxu1 %v154_v56  ;;  %307 = vmatpush.msra.mxu2 %v154_v56 }
  0xb5   :  { %215 = vmatpush.msra.mxu1 %v153_v57  ;;  %308 = vmatpush.msra.mxu2 %v153_v57 }
  0xb7   :  { %216 = vmatpush.msra.mxu1 %v152_v58  ;;  %309 = vmatpush.msra.mxu2 %v152_v58 }
  0xb8   :  { %292 = vmatmul.msk.f32.vlgmr.msra.gmra.mxu1 %vm188_vm1, %v160_v59  ;;  %295 = vmatmul.msk.f32.vlgmr.msra.gmra.mxu2 %vm188_vm1, %v163_v60 }
  0xc0   :  { %293 = vmatmul.msk.f32.gmra.mxu1 %vm188_vm1, %v161_v61 }
  0xc8   :  { %294 = vmatmul.msk.f32.gmra.mxu1 %vm188_vm1, %v162_v62 }
 0x135   :  { %v218_v63 = vpop.f32.mrf.mxu1 }
 0x136   :  { %v219_v11 = vadd.f32 %v218_v63, %v171_v10 }
 0x138   :  { %v230_v14 = vmax.f32 %v219_v11, 0.0 }
 0x13b   :  { %v227_v1 = vpop.f32.mrf.mxu2 }
 0x13c   :  { %v228_v2 = vadd.f32 %v227_v1, %v186_v0 }
 0x13d   :  { %v221_v3 = vpop.f32.mrf.mxu1 }
 0x13e   :  { %v233_v4 = vmax.f32 %v228_v2, 0.0  ;;  %v222_v8 = vadd.f32 %v221_v3, %v176_v6 }
 0x140   :  { %266 = vmatpush.msrb.mxu2 %v233_v4  ;;  %v231_v13 = vmax.f32 %v222_v8, 0.0 }
 0x145   :  { %v224_v7 = vpop.f32.mrf.mxu1 }
 0x146   :  { %v225_v9 = vadd.f32 %v224_v7, %v181_v5 }
 0x148   :  { %v232_v12 = vmax.f32 %v225_v9, 0.0 }
 0x14a   :  { %267 = vmatpush.msrb.mxu2 %v232_v12 }
 0x14c   :  { %268 = vmatpush.msrb.mxu2 %v231_v13 }
 0x14e   :  { %269 = vmatpush.msrb.mxu2 %v230_v14 }
 0x14f   :  { %296 = vmatmul.msk.f32.vlgmr.msrb.gmra.mxu2 %vm86_vm0, %v234_v15 }
 0x157   :  { %297 = vmatmul.msk.f32.gmra.mxu2 %vm86_vm0, %v235_v16 }
 0x1d2   :  { %v271_v18 = vpop.f32.mrf.mxu2 }
 0x1d3   :  { %v272_v19 = vadd.f32 %v271_v18, %v241_v17 }
 0x1d5   :  { %278 = vst.msk [vmem:[%s474_s7] sm:$0xff] %vm277_vm2, %v272_v19 }
 0x1da   :  { %v274_v21 = vpop.f32.mrf.mxu2 }
 0x1db   :  { %v275_v22 = vadd.f32 %v274_v21, %v246_v20 }
 0x1dd   :  { %279 = vst.msk [vmem:[%s474_s7 + $0x8] sm:$0xff] %vm277_vm2, %v275_v22 }

</bundles_post_ra>
